<compile_context>
chip_gen: v7x
topology: tpu7x:2x2x1
jax: 0.10.0
libtpu: 0.0.40
codegen_flags: <defaults>
</compile_context>

<pallas_src>
import math
from functools import partial

import jax
import jax.numpy as jnp
from jax.experimental import pallas as pl
from jax.experimental.pallas import tpu as pltpu

_INV_SQRT2 = 1.0 / math.sqrt(2.0)
_SQRT_2_OVER_PI = math.sqrt(2.0 / math.pi)


def _gelu_f32(h, approximate):
    if approximate:
        # tanh approximation — runs on the otherwise-idle EUP slot.
        return 0.5 * h * (1.0 + jnp.tanh(_SQRT_2_OVER_PI * (h + 0.044715 * h * h * h)))
    # Exact erf GELU == nn.GELU(approximate='none').
    return 0.5 * h * (1.0 + jax.lax.erf(h * _INV_SQRT2))


def _ffn_kernel_resident(x_ref, w1_ref, w2_ref, o_ref, *, approximate):
    # Weights fully resident in VMEM; single hidden step -> no accumulator.
    h = jnp.dot(x_ref[...], w1_ref[...], preferred_element_type=jnp.float32)
    h = _gelu_f32(h, approximate)
    o_ref[...] = jnp.dot(h.astype(w2_ref.dtype), w2_ref[...],
                         preferred_element_type=jnp.float32).astype(o_ref.dtype)


def _ffn_kernel_streamed(x_ref, w1_ref, w2_ref, o_ref, acc_ref, *, approximate):
    # Hidden (4E) axis tiled; f32 accumulator persists across hidden steps.
    h_idx = pl.program_id(1)

    @pl.when(h_idx == 0)
    def _init():
        acc_ref[...] = jnp.zeros_like(acc_ref)

    h = jnp.dot(x_ref[...], w1_ref[...], preferred_element_type=jnp.float32)
    h = _gelu_f32(h, approximate)
    acc_ref[...] += jnp.dot(h.astype(w2_ref.dtype), w2_ref[...],
                            preferred_element_type=jnp.float32)

    @pl.when(h_idx == pl.num_programs(1) - 1)
    def _finalize():
        # TODO(synk): nn.Dropout is identity in eval mode; training-mode
        # dropout (pltpu.prng_random_bits mask) is intentionally not implemented.
        o_ref[...] = acc_ref[...].astype(o_ref.dtype)


def _round_up(x, m):
    return (x + m - 1) // m * m


def _usable_vmem_bytes():
    """Generation-aware VMEM budget with headroom for Mosaic internal scratch."""
    try:
        cap = int(pltpu.get_tpu_info().vmem_capacity_bytes)
    except Exception:
        cap = 64 << 20  # conservative (v7x-sized) fallback
    # 64 MiB parts -> ~48 MiB budget; 128 MiB parts -> ~100 MiB budget.
    return max(32 << 20, min(cap - (16 << 20), int(cap * 0.8)))


def _vmem_need(tile_m, tile_h, n_h, E_pad, itemsize, out_itemsize):
    need = 2 * tile_m * E_pad * itemsize                 # x tile, double-buffered
    need += 2 * (2 * E_pad * tile_h) * itemsize          # w1 + w2, double-buffered
    need += 2 * tile_m * E_pad * out_itemsize            # out tile, double-buffered
    need += tile_m * tile_h * (4 + itemsize)             # f32 GELU tile + compute-dtype cast
    if n_h > 1:
        need += tile_m * E_pad * 4                       # f32 accumulator scratch
    return need


def make_feed_forward(w_fc, w_proj, *, compute_dtype=None, out_dtype=None,
                      gelu_approx=False, tile_m=None, tile_h=None):
    """Build a fused GPT-2 FFN callable:  out = GELU(x @ w_fc.T) @ w_proj.T.

    Weight transpose (from PyTorch layout), dtype cast and padding all happen
    ONCE here (parameter-load time), never in the per-call hot path.

    Args:
      w_fc:   (4E, E)  == c_fc.weight   (PyTorch layout)
      w_proj: (E, 4E)  == c_proj.weight (PyTorch layout)
      compute_dtype: dtype fed to the MXU.  bfloat16 is recommended on all of
        v5e / v6e / v7x (halves streamed weight bytes and uses the fast MXU
        path); accumulation and GELU stay f32 regardless.  Defaults to the
        weights' dtype.
      out_dtype: output dtype (default: the call-time x.dtype).
      gelu_approx: use tanh-approx GELU (EUP slot) instead of exact erf
        (VALU-heavy).  Default False == nn.GELU(approximate='none') numerics.
      tile_m / tile_h: optional manual tile overrides.
    """
    H, E = w_fc.shape
    assert w_proj.shape == (E, H), "w_proj must be (E, 4E) PyTorch layout"

    cd = jnp.dtype(compute_dtype) if compute_dtype is not None else jnp.dtype(w_fc.dtype)
    itemsize = cd.itemsize
    min_sub = 16 if itemsize == 2 else 8     # bf16 packs 16 sublanes / vreg

    E_pad = _round_up(E, 128)                # lane-dense in/out (unmasked vst)
    H128 = _round_up(H, 128)

    usable = _usable_vmem_bytes()

    # Planning row tile (the actual per-call tile is clamped to the row count).
    if tile_m is None:
        plan_tile_m = 512 if usable <= (56 << 20) else (1024 if itemsize == 2 else 512)
    else:
        plan_tile_m = _round_up(max(tile_m, min_sub), min_sub)

    plan_out_is = 4  # plan for an f32 output double-buffer (worst case)

    # Hidden tile: fully resident if everything fits the budget, else stream
    # the largest hidden slice that fits.
    if tile_h is None:
        if _vmem_need(plan_tile_m, H128, 1, E_pad, itemsize, plan_out_is) <= usable:
            tile_h = H128
        else:
            tile_h = 128
            for cand in (1024, 512, 256, 128):
                cand = min(cand, H128)
                if _vmem_need(plan_tile_m, cand, 2, E_pad, itemsize, plan_out_is) <= usable:
                    tile_h = cand
                    break
    tile_h = _round_up(min(tile_h, H128), 128)
    H_pad = _round_up(H, tile_h)
    n_h = H_pad // tile_h

    # One-time weight preparation: transpose from PyTorch layout, cast, pad.
    w1p = jnp.asarray(w_fc).T.astype(cd)     # (E, 4E)
    w2p = jnp.asarray(w_proj).T.astype(cd)   # (4E, E)
    if (E_pad, H_pad) != (E, H):
        w1p = jnp.pad(w1p, ((0, E_pad - E), (0, H_pad - H)))
        w2p = jnp.pad(w2p, ((0, H_pad - H), (0, E_pad - E)))
    w1p, w2p = jax.block_until_ready((w1p, w2p))
    weight_bytes = (w1p.size + w2p.size) * itemsize

    def ffn(x):
        B, T, E_in = x.shape
        assert E_in == E
        od = jnp.dtype(out_dtype) if out_dtype is not None else jnp.dtype(x.dtype)
        out_is = od.itemsize

        M = B * T
        tm = max(min(plan_tile_m, _round_up(M, min_sub)), min_sub)
        while tm > min_sub and _vmem_need(tm, tile_h, n_h, E_pad, itemsize, out_is) > usable:
            tm = max(min_sub, _round_up(tm // 2, min_sub))
        M_pad = _round_up(M, tm)
        n_m = M_pad // tm

        x2d = x.reshape(M, E).astype(cd)
        if (M_pad, E_pad) != (M, E):
            x2d = jnp.pad(x2d, ((0, M_pad - M), (0, E_pad - E)))

        need = _vmem_need(tm, tile_h, n_h, E_pad, itemsize, out_is)
        vmem_limit = int(min(max(need * 1.25 + (2 << 20), 32 << 20), usable))

        cost = pl.CostEstimate(
            flops=4 * M_pad * E_pad * H_pad,            # two matmuls
            transcendentals=M_pad * H_pad,              # erf / tanh
            bytes_accessed=(x2d.size * itemsize
                            + (1 if n_h == 1 else n_m) * weight_bytes
                            + M_pad * E_pad * out_is),
        )

        if n_h == 1:
            # Fast path: weights VMEM-resident, 1-D grid, no accumulator.
            kern = partial(_ffn_kernel_resident, approximate=gelu_approx)
            grid_spec = pltpu.PrefetchScalarGridSpec(
                num_scalar_prefetch=0,
                grid=(n_m,),
                in_specs=[
                    pl.BlockSpec((tm, E_pad), lambda i: (i, 0)),
                    pl.BlockSpec((E_pad, H_pad), lambda i: (0, 0)),
                    pl.BlockSpec((H_pad, E_pad), lambda i: (0, 0)),
                ],
                out_specs=pl.BlockSpec((tm, E_pad), lambda i: (i, 0)),
            )
            dims = ("parallel",)
        else:
            # Streaming path: hidden axis tiled, f32 accumulator across it.
            kern = partial(_ffn_kernel_streamed, approximate=gelu_approx)
            grid_spec = pltpu.PrefetchScalarGridSpec(
                num_scalar_prefetch=0,
                grid=(n_m, n_h),
                in_specs=[
                    pl.BlockSpec((tm, E_pad), lambda i, h: (i, 0)),
                    pl.BlockSpec((E_pad, tile_h), lambda i, h: (0, h)),
                    pl.BlockSpec((tile_h, E_pad), lambda i, h: (h, 0)),
                ],
                out_specs=pl.BlockSpec((tm, E_pad), lambda i, h: (i, 0)),
                scratch_shapes=[pltpu.VMEM((tm, E_pad), jnp.float32)],
            )
            dims = ("parallel", "arbitrary")

        out2d = pl.pallas_call(
            kern,
            out_shape=jax.ShapeDtypeStruct((M_pad, E_pad), od),
            grid_spec=grid_spec,
            compiler_params=pltpu.CompilerParams(
                dimension_semantics=dims,
                vmem_limit_bytes=vmem_limit),
            cost_estimate=cost,
        )(x2d, w1p, w2p)

        return out2d[:M, :E].reshape(B, T, E)

    return ffn


if __name__ == "__main__":
    # Small shapes implied by the module: batch=2, seq=8, embed_dim=32.
    B, T, E = 2, 8, 32
    H = 4 * E

    key = jax.random.PRNGKey(0)
    kx, kfc, kproj = jax.random.split(key, 3)

    x = jax.random.normal(kx, (B, T, E), dtype=jnp.float32)
    # PyTorch parameter layouts: c_fc.weight (4E, E), c_proj.weight (E, 4E).
    w_fc = 0.02 * jax.random.normal(kfc, (H, E), dtype=jnp.float32)
    w_proj = 0.02 * jax.random.normal(kproj, (E, H), dtype=jnp.float32)

    # ---- fp32 path (resident fast path): exact match vs pure-JAX reference ----
    ffn_f32 = make_feed_forward(w_fc, w_proj)      # weight prep happens ONCE here
    out = jax.block_until_ready(ffn_f32(x))
    h_ref = x.reshape(-1, E) @ w_fc.T
    h_ref = 0.5 * h_ref * (1.0 + jax.lax.erf(h_ref / math.sqrt(2.0)))
    ref = (h_ref @ w_proj.T).reshape(B, T, E)
    assert out.shape == (B, T, E)
    assert jnp.allclose(out, ref, atol=1e-5, rtol=1e-5), "fp32 mismatch vs reference"

    # ---- bf16 compute path (recommended on v5e/v6e/v7x) ----
    ffn_bf16 = make_feed_forward(w_fc, w_proj, compute_dtype=jnp.bfloat16)
    out_bf16 = jax.block_until_ready(ffn_bf16(x))
    xb = x.reshape(-1, E).astype(jnp.bfloat16)
    hb = jnp.dot(xb, w_fc.T.astype(jnp.bfloat16), preferred_element_type=jnp.float32)
    hb = 0.5 * hb * (1.0 + jax.lax.erf(hb / math.sqrt(2.0)))
    ref_bf16 = jnp.dot(hb.astype(jnp.bfloat16), w_proj.T.astype(jnp.bfloat16),
                       preferred_element_type=jnp.float32
                       ).astype(x.dtype).reshape(B, T, E)
    assert jnp.allclose(out_bf16, ref_bf16, atol=1e-4, rtol=1e-2), \
        "bf16 mismatch vs reference"

    # ---- streaming (accumulator) path, exercised with E=64 / forced tile_h ----
    E2, H2 = 64, 256
    k2x, k2fc, k2proj = jax.random.split(jax.random.PRNGKey(0), 3)
    x2 = jax.random.normal(k2x, (B, T, E2), dtype=jnp.float32)
    w_fc2 = 0.02 * jax.random.normal(k2fc, (H2, E2), dtype=jnp.float32)
    w_proj2 = 0.02 * jax.random.normal(k2proj, (E2, H2), dtype=jnp.float32)
    ffn_stream = make_feed_forward(w_fc2, w_proj2, tile_h=128)   # n_h = 2
    out_s = jax.block_until_ready(ffn_stream(x2))
    h2 = x2.reshape(-1, E2) @ w_fc2.T
    h2 = 0.5 * h2 * (1.0 + jax.lax.erf(h2 / math.sqrt(2.0)))
    ref_s = (h2 @ w_proj2.T).reshape(B, T, E2)
    assert jnp.allclose(out_s, ref_s, atol=1e-5, rtol=1e-5), \
        "streaming-path mismatch vs reference"

    print("KERNEL_OK")
</pallas_src>

<mosaic_0001>
module attributes {stable_mosaic.version = 11 : i64} {
  func.func @_ffn_kernel_resident(%arg0: i32, %arg1: memref<16x128xf32, #tpu.memory_space<vmem>>, %arg2: memref<128x128xf32, #tpu.memory_space<vmem>>, %arg3: memref<128x128xf32, #tpu.memory_space<vmem>>, %arg4: memref<16x128xf32, #tpu.memory_space<vmem>>) attributes {dimension_semantics = [#tpu.dimension_semantics<parallel>], iteration_bounds = array<i64: 1>, scalar_prefetch = 0 : i64, scratch_operands = 0 : i64, tpu.core_type = #tpu.core_type<tc>, window_params = [{transform_indices = @transform_0, window_bounds = array<i64: 16, 128>}, {pipeline_mode = #tpu.pipeline_mode<synchronous>, transform_indices = @transform_1, window_bounds = array<i64: 128, 128>}, {pipeline_mode = #tpu.pipeline_mode<synchronous>, transform_indices = @transform_2, window_bounds = array<i64: 128, 128>}, {transform_indices = @transform_3, window_bounds = array<i64: 16, 128>}]} {
    %c0 = arith.constant 0 : index
    %c0_0 = arith.constant 0 : index
    %0 = vector.load %arg1[%c0, %c0_0] : memref<16x128xf32, #tpu.memory_space<vmem>>, vector<16x128xf32>
    %c0_1 = arith.constant 0 : index
    %c0_2 = arith.constant 0 : index
    %1 = vector.load %arg2[%c0_1, %c0_2] : memref<128x128xf32, #tpu.memory_space<vmem>>, vector<128x128xf32>
    %cst = arith.constant dense<0.000000e+00> : vector<16x128xf32>
    %2 = tpu.matmul %0, %1, %cst {dimension_numbers = #tpu.dot_dimension_numbers<[1], [0], [0], [1], [0, 0, 1, 1], [], []>} : vector<16x128xf32>, vector<128x128xf32>, vector<16x128xf32> -> vector<16x128xf32>
    %cst_3 = arith.constant 5.000000e-01 : f32
    %3 = vector.broadcast %cst_3 : f32 to vector<16x128xf32>
    %4 = arith.mulf %3, %2 : vector<16x128xf32>
    %cst_4 = arith.constant 0.707106769 : f32
    %5 = vector.broadcast %cst_4 : f32 to vector<16x128xf32>
    %6 = arith.mulf %2, %5 : vector<16x128xf32>
    %7 = math.erf %6 : vector<16x128xf32>
    %cst_5 = arith.constant 1.000000e+00 : f32
    %8 = vector.broadcast %cst_5 : f32 to vector<16x128xf32>
    %9 = arith.addf %8, %7 : vector<16x128xf32>
    %10 = arith.mulf %4, %9 : vector<16x128xf32>
    %c0_6 = arith.constant 0 : index
    %c0_7 = arith.constant 0 : index
    %11 = vector.load %arg3[%c0_6, %c0_7] : memref<128x128xf32, #tpu.memory_space<vmem>>, vector<128x128xf32>
    %cst_8 = arith.constant dense<0.000000e+00> : vector<16x128xf32>
    %12 = tpu.matmul %10, %11, %cst_8 {dimension_numbers = #tpu.dot_dimension_numbers<[1], [0], [0], [1], [0, 0, 1, 1], [], []>} : vector<16x128xf32>, vector<128x128xf32>, vector<16x128xf32> -> vector<16x128xf32>
    %c0_9 = arith.constant 0 : index
    %c0_10 = arith.constant 0 : index
    %13 = vector.load %arg4[%c0_9, %c0_10] : memref<16x128xf32, #tpu.memory_space<vmem>>, vector<16x128xf32>
    tpu.vector_store %arg4[%c0_9, %c0_10], %12 {strides = array<i32>} : memref<16x128xf32, #tpu.memory_space<vmem>>, vector<16x128xf32>,
    return
  }
  func.func @transform_0(%arg0: i32) -> (i32, i32) {
    %c0_i32 = arith.constant 0 : i32
    %c0_i32_0 = arith.constant 0 : i32
    return %arg0, %c0_i32 : i32, i32
  }
  func.func @transform_1(%arg0: i32) -> (i32, i32) {
    %c0_i32 = arith.constant 0 : i32
    %c0_i32_0 = arith.constant 0 : i32
    %c0_i32_1 = arith.constant 0 : i32
    return %c0_i32, %c0_i32_0 : i32, i32
  }
  func.func @transform_2(%arg0: i32) -> (i32, i32) {
    %c0_i32 = arith.constant 0 : i32
    %c0_i32_0 = arith.constant 0 : i32
    %c0_i32_1 = arith.constant 0 : i32
    return %c0_i32, %c0_i32_0 : i32, i32
  }
  func.func @transform_3(%arg0: i32) -> (i32, i32) {
    %c0_i32 = arith.constant 0 : i32
    %c0_i32_0 = arith.constant 0 : i32
    return %arg0, %c0_i32 : i32, i32
  }
}

</mosaic_0001>

<bundles_post_ra>
// kernel: tpu_custom_call.1
= control target key start
LH: loop header
LB: loop body
LE: loop exit
PB: predicated region body
PF: predicated region fallthrough
CT: control target
= control target key end

     0   :  { %8 = vsyncpa [#allocation3], 0  ;;  %s637_s0 = inlined_call_operand.hbm [shape: f32[16,128], index: 0, kind: input, shape index: {}]   ;;  %s638_s1 = inlined_call_operand.hbm [shape: f32[128,128], index: 1, kind: input, shape index: {}]   ;;  %s639_s2 = inlined_call_operand.hbm [shape: f32[128,128], index: 2, kind: input, shape index: {}]   ;;  %s640_s3 = inlined_call_operand.hbm [shape: f32[16,128], index: 3, kind: output, shape index: {}]  }
   0x1   :  { %9 = vsyncpa [#allocation6], 0 }
   0x2   :  { %10 = vsyncpa [#allocation4], 0  ;;  %s544_s12 = smov [#allocation5]   ;;  %s545_s14 = smov [#allocation2]  }
   0x3   :  { %s28_s13 = sshll.u32 %s544_s12, 4  ;;  %s16_s15 = sshll.u32 %s545_s14, 4  ;;  %s29_s13 = int_to_ptr.vmem [resolvable:$true] %s28_s13  ;;  %s570_s15 = int_to_ptr.vmem [resolvable:$true] %s16_s15 }
   0x4   :  { %s450_s18 = scalar_lea.hbm %s638_s1, 2048 }
   0x5   :  { %p451_p0 = scmp.ne.s32.totalorder %s638_s1, %s450_s18  ;;  %p454_p1 = scmp.lt.u32.totalorder %s450_s18, %s638_s1 }
   0x7   :  { %p456_p2 = pnand %p454_p1, %p451_p0 }
   0x9   :  { %459 = shalt.err (!%p456_p2)
}
   0xa   :  { %s460_s23 = scalar_lea.vmem %s29_s13, 2048  ;;  %p465_p4 = scmp.lt.s32.totalorder %s29_s13, %s29_s13 }
   0xb   :  { %p461_p3 = scmp.ne.s32.totalorder %s29_s13, %s460_s23  ;;  %p466_p5 = scmp.lt.s32.totalorder %s460_s23, %s460_s23 }
   0xd   :  { %p467_p6 = por %p466_p5, %p465_p4 }
   0xf   :  { %p468_p7 = pnand %p467_p6, %p461_p3 }
  0x11   :  { %471 = shalt.err (!%p468_p7)
}
  0x12   :  { %s546_s24 = smov 128   ;;  %s547_s25 = smov 8  }
  0x13   :  { %34 = dma.hbm_to_vmem [thread:$0]  %s638_s1, 2048, %s29_s13, [#allocation6], %s546_s24, %s546_s24, %s547_s25  }
  0x14   :  { %s472_s30 = scalar_lea.hbm %s637_s0, 256 }
  0x15   :  { %p473_p8 = scmp.ne.s32.totalorder %s637_s0, %s472_s30  ;;  %p476_p9 = scmp.lt.u32.totalorder %s472_s30, %s637_s0 }
  0x17   :  { %p478_p10 = pnand %p476_p9, %p473_p8 }
  0x19   :  { %481 = shalt.err (!%p478_p10)
}
  0x1a   :  { %s482_s8 = scalar_lea.vmem %s570_s15, 256  ;;  %p487_p12 = scmp.lt.s32.totalorder %s570_s15, %s570_s15 }
  0x1b   :  { %p483_p11 = scmp.ne.s32.totalorder %s570_s15, %s482_s8  ;;  %p488_p13 = scmp.lt.s32.totalorder %s482_s8, %s482_s8 }
  0x1d   :  { %p489_p0 = por %p488_p13, %p487_p12 }
  0x1f   :  { %p490_p1 = pnand %p489_p0, %p483_p11 }
  0x21   :  { %493 = shalt.err (!%p490_p1)
}
  0x22   :  { %22 = dma.hbm_to_vmem [thread:$0]  %s637_s0, 256, %s570_s15, [#allocation3], %s546_s24, %s546_s24, %s547_s25  }
  0x23   :  { %s548_s10 = smov [#allocation7]   ;;  %s494_s14 = scalar_lea.hbm %s639_s2, 2048 }
  0x24   :  { %s40_s11 = sshll.u32 %s548_s10, 4  ;;  %p495_p2 = scmp.ne.s32.totalorder %s639_s2, %s494_s14  ;;  %s41_s11 = int_to_ptr.vmem [resolvable:$true] %s40_s11 }
  0x25   :  { %p498_p3 = scmp.lt.u32.totalorder %s494_s14, %s639_s2 }
  0x27   :  { %p500_p4 = pnand %p498_p3, %p495_p2 }
  0x29   :  { %503 = shalt.err (!%p500_p4)
}
  0x2a   :  { %s504_s20 = scalar_lea.vmem %s41_s11, 2048  ;;  %p509_p6 = scmp.lt.s32.totalorder %s41_s11, %s41_s11 }
  0x2b   :  { %p505_p5 = scmp.ne.s32.totalorder %s41_s11, %s504_s20  ;;  %p510_p7 = scmp.lt.s32.totalorder %s504_s20, %s504_s20 }
  0x2d   :  { %p511_p8 = por %p510_p7, %p509_p6 }
  0x2f   :  { %p512_p9 = pnand %p511_p8, %p505_p5 }
  0x31   :  { %515 = shalt.err (!%p512_p9)
}
  0x32   :  { %46 = dma.hbm_to_vmem [thread:$0]  %s639_s2, 2048, %s41_s11, [#allocation6], %s546_s24, %s546_s24, %s547_s25  }
  0x33   :  { %538 = dma.done.wait [#allocation3], 256  }
  0x34   :  { %539 = vsyncadd [#allocation3], 4294967040 }
  0x35   :  { %540 = dma.done.wait [#allocation6], 4096  }
  0x36   :  { %541 = vsyncadd [#allocation6], 4294963200  ;;  %v58_v0 = vld [vmem:[#allocation5] sm:$0xff]  ;;  %v59_v1 = vld [vmem:[#allocation5 + $0x8] sm:$0xff]  ;;  %s549_s2 = smov [#allocation8]  }
  0x37   :  { %v60_v2 = vld [vmem:[#allocation5 + $0x10] sm:$0xff]  ;;  %v376_v3 = vpack.c.bf16 %v59_v1, %v58_v0  ;;  %v61_v4 = vld [vmem:[#allocation5 + $0x18] sm:$0xff]  ;;  %v62_v6 = vld [vmem:[#allocation5 + $0x20] sm:$0xff]  ;;  %s257_s21 = sshll.u32 %s549_s2, 4  ;;  %s258_s21 = int_to_ptr.vmem [resolvable:$true] %s257_s21 }
  0x38   :  { %v380_v5 = vpack.c.bf16 %v61_v4, %v60_v2  ;;  %v63_v7 = vld [vmem:[#allocation5 + $0x28] sm:$0xff]  ;;  %v64_v9 = vld [vmem:[#allocation5 + $0x30] sm:$0xff]  ;;  %v65_v10 = vld [vmem:[#allocation5 + $0x38] sm:$0xff]  ;;  %s516_s22 = scalar_lea.vmem %s258_s21, 256  ;;  %p521_p11 = scmp.lt.s32.totalorder %s258_s21, %s258_s21 }
  0x39   :  { %377 = vmatprep.subr.bf16.mxu0 %v376_v3  ;;  %v384_v8 = vpack.c.bf16 %v63_v7, %v62_v6  ;;  %v56_v11 = vld [vmem:[#allocation2] sm:$0xff]  ;;  %v159_v12 = vld [vmem:[#allocation7] sm:$0xff]  ;;  %v160_v13 = vld [vmem:[#allocation7 + $0x8] sm:$0xff]  ;;  %v388_v20 = vpack.c.bf16 %v65_v10, %v64_v9  ;;  %p517_p10 = scmp.ne.s32.totalorder %s258_s21, %s516_s22  ;;  %p522_p12 = scmp.lt.s32.totalorder %s516_s22, %s516_s22 }
  0x3a   :  { %379 = vmatpush3.bf16.msra.mxu0 %v376_v3  ;;  %338 = vmatprep.mubr.f32.mxu0 %v56_v11  ;;  %v161_v14 = vld [vmem:[#allocation7 + $0x10] sm:$0xff]  ;;  %v408_v15 = vpack.c.bf16 %v160_v13, %v159_v12  ;;  %v162_v16 = vld [vmem:[#allocation7 + $0x18] sm:$0xff]  ;;  %v163_v18 = vld [vmem:[#allocation7 + $0x20] sm:$0xff] }
  0x3b   :  { %381 = vmatprep.subr.bf16.mxu0 %v380_v5  ;;  %v412_v17 = vpack.c.bf16 %v162_v16, %v161_v14  ;;  %v164_v19 = vld [vmem:[#allocation7 + $0x28] sm:$0xff]  ;;  %v66_v21 = vld [vmem:[#allocation5 + $0x40] sm:$0xff]  ;;  %v68_v25 = vld [vmem:[#allocation5 + $0x50] sm:$0xff]  ;;  %p523_p13 = por %p522_p12, %p521_p11 }
  0x3c   :  { %409 = vmatprep.subr.bf16.mxu1 %v408_v15  ;;  %v67_v22 = vld [vmem:[#allocation5 + $0x48] sm:$0xff]  ;;  %v416_v23 = vpack.c.bf16 %v164_v19, %v163_v18  ;;  %v69_v26 = vld [vmem:[#allocation5 + $0x58] sm:$0xff]  ;;  %v70_v28 = vld [vmem:[#allocation5 + $0x60] sm:$0xff] }
  0x3d   :  { %411 = vmatpush3.bf16.msra.mxu1 %v408_v15  ;;  %v392_v24 = vpack.c.bf16 %v67_v22, %v66_v21  ;;  %v396_v27 = vpack.c.bf16 %v69_v26, %v68_v25  ;;  %v71_v29 = vld [vmem:[#allocation5 + $0x68] sm:$0xff]  ;;  %v72_v31 = vld [vmem:[#allocation5 + $0x70] sm:$0xff]  ;;  %v73_v32 = vld [vmem:[#allocation5 + $0x78] sm:$0xff]  ;;  %p524_p0 = pnand %p523_p13, %p517_p10 }
  0x3e   :  { %383 = vmatpush3.bf16.msra.mxu0 %v380_v5  ;;  %413 = vmatprep.subr.bf16.mxu1 %v412_v17  ;;  %v400_v30 = vpack.c.bf16 %v71_v29, %v70_v28  ;;  %v404_v33 = vpack.c.bf16 %v73_v32, %v72_v31  ;;  %v57_v34 = vld [vmem:[#allocation2 + $0x8] sm:$0xff]  ;;  %v165_v35 = vld [vmem:[#allocation7 + $0x30] sm:$0xff]  ;;  %v167_v38 = vld [vmem:[#allocation7 + $0x40] sm:$0xff] }
  0x3f   :  { %385 = vmatprep.subr.bf16.mxu0 %v384_v8  ;;  %v166_v36 = vld [vmem:[#allocation7 + $0x38] sm:$0xff]  ;;  %v168_v39 = vld [vmem:[#allocation7 + $0x48] sm:$0xff]  ;;  %v169_v41 = vld [vmem:[#allocation7 + $0x50] sm:$0xff] }
  0x40   :  { %v420_v37 = vpack.c.bf16 %v166_v36, %v165_v35  ;;  %v424_v40 = vpack.c.bf16 %v168_v39, %v167_v38  ;;  %v170_v42 = vld [vmem:[#allocation7 + $0x58] sm:$0xff]  ;;  %v171_v44 = vld [vmem:[#allocation7 + $0x60] sm:$0xff]  ;;  %v172_v45 = vld [vmem:[#allocation7 + $0x68] sm:$0xff] }
  0x41   :  { %415 = vmatpush3.bf16.msra.mxu1 %v412_v17  ;;  %v428_v43 = vpack.c.bf16 %v170_v42, %v169_v41  ;;  %v432_v46 = vpack.c.bf16 %v172_v45, %v171_v44  ;;  %v173_v47 = vld [vmem:[#allocation7 + $0x70] sm:$0xff]  ;;  %v174_v48 = vld [vmem:[#allocation7 + $0x78] sm:$0xff] }
  0x42   :  { %387 = vmatpush3.bf16.msra.mxu0 %v384_v8  ;;  %417 = vmatprep.subr.bf16.mxu1 %v416_v23  ;;  %v436_v49 = vpack.c.bf16 %v174_v48, %v173_v47 }
  0x43   :  { %389 = vmatprep.subr.bf16.mxu0 %v388_v20 }
  0x45   :  { %419 = vmatpush3.bf16.msra.mxu1 %v416_v23 }
  0x46   :  { %391 = vmatpush3.bf16.msra.mxu0 %v388_v20  ;;  %421 = vmatprep.subr.bf16.mxu1 %v420_v37 }
  0x47   :  { %393 = vmatprep.subr.bf16.mxu0 %v392_v24 }
  0x49   :  { %423 = vmatpush3.bf16.msra.mxu1 %v420_v37 }
  0x4a   :  { %395 = vmatpush3.bf16.msra.mxu0 %v392_v24  ;;  %425 = vmatprep.subr.bf16.mxu1 %v424_v40 }
  0x4b   :  { %397 = vmatprep.subr.bf16.mxu0 %v396_v27 }
  0x4d   :  { %427 = vmatpush3.bf16.msra.mxu1 %v424_v40 }
  0x4e   :  { %399 = vmatpush3.bf16.msra.mxu0 %v396_v27  ;;  %429 = vmatprep.subr.bf16.mxu1 %v428_v43 }
  0x4f   :  { %401 = vmatprep.subr.bf16.mxu0 %v400_v30 }
  0x51   :  { %431 = vmatpush3.bf16.msra.mxu1 %v428_v43 }
  0x52   :  { %403 = vmatpush3.bf16.msra.mxu0 %v400_v30  ;;  %433 = vmatprep.subr.bf16.mxu1 %v432_v46 }
  0x53   :  { %405 = vmatprep.subr.bf16.mxu0 %v404_v33 }
  0x55   :  { %435 = vmatpush3.bf16.msra.mxu1 %v432_v46 }
  0x56   :  { %407 = vmatpush3.bf16.msra.mxu0 %v404_v33  ;;  %437 = vmatprep.subr.bf16.mxu1 %v436_v49 }
  0x59   :  { %339 = vmatmul.mubr.f32.vlgmr.msra.gmra.mrb[0].mxu0 %v57_v34  ;;  %439 = vmatpush3.bf16.msra.mxu1 %v436_v49 }
 0x12c   :  { %v340_v50 = vpop.f32.mrb[0].mxu0 }
 0x12d   :  { %v152_v51 = vmul.f32 0.70710677, %v340_v50  ;;  %v140_v52 = vpop.f32.mrb[1].mxu0  ;;  %v150_v59 = vmul.f32 0.5, %v340_v50 }
 0x12e   :  { %v151_v53 = vmul.f32 0.70710677, %v140_v52  ;;  %v149_v57 = vmul.f32 0.5, %v140_v52 }
 0x12f   :  { %446 = verf.f32 %v152_v51 }
 0x130   :  { %448 = verf.f32 %v151_v53 }
 0x139   :  { %v447_v54 = vpop.eup %446 }
 0x13a   :  { %v449_v55 = vpop.eup %448  ;;  %v156_v56 = vadd.f32 1.0, %v447_v54 }
 0x13b   :  { %v155_v58 = vadd.f32 1.0, %v449_v55 }
 0x13c   :  { %v158_v61 = vmul.f32 %v156_v56, %v150_v59 }
 0x13d   :  { %v157_v60 = vmul.f32 %v155_v58, %v149_v57 }
 0x13f   :  { %373 = vmatprep.mubr.f32.mxu1 %v157_v60 }
 0x140   :  { %374 = vmatmul.mubr.f32.vlgmr.msra.gmra.mrb[0].mxu1 %v158_v61 }
 0x213   :  { %v375_v62 = vpop.f32.mrb[0].mxu1 }
 0x214   :  { %251 = vst [vmem:[#allocation8 + $0x8] sm:$0xff] %v375_v62  ;;  %v241_v63 = vpop.f32.mrb[1].mxu1 }
 0x215   :  { %250 = vst [vmem:[#allocation8] sm:$0xff] %v241_v63 }
 0x216   :  { %527 = shalt.err (!%p524_p0)
}
 0x217   :  { %s528_s27 = scalar_lea.hbm %s640_s3, 256 }
 0x218   :  { %p529_p1 = scmp.ne.s32.totalorder %s640_s3, %s528_s27  ;;  %p532_p2 = scmp.lt.u32.totalorder %s528_s27, %s640_s3 }
 0x21a   :  { %p534_p3 = pnand %p532_p2, %p529_p1 }
 0x21c   :  { %537 = shalt.err (!%p534_p3)
}
 0x21d   :  { %263 = dma.vmem_to_hbm [thread:$0]  %s258_s21, 256, %s640_s3, [#allocation4], %s546_s24, %s546_s24, %s547_s25  }
 0x21e   :  { %542 = dma.done.wait [#allocation4], 256  }
 0x21f   :  { %543 = vsyncadd [#allocation4], 4294967040 }
 0x220   :  { %267 = vsyncpa [#allocation3], 1 }
 0x221   :  { %268 = vsyncpa [#allocation6], 1 }
 0x222   :  { %269 = vsyncpa [#allocation4], 1 }

</bundles_post_ra>
